<compile_context>
chip_gen: v5e
topology: v5e:2x2
jax: 0.10.0
libtpu: 0.0.40
codegen_flags: <defaults>
</compile_context>

<pallas_src>
import jax
import jax.numpy as jnp
from jax import lax
from jax.experimental import pallas as pl
from jax.experimental.pallas import tpu as pltpu


def _round_up(a, b):
    return (a + b - 1) // b * b


def _pick_tile_f(f_padded, cap):
    """Largest multiple of 128 that divides f_padded and is <= cap (>=128)."""
    q = f_padded // 128
    best = 1
    for d in range(1, q + 1):
        if q % d == 0 and 128 * d <= cap:
            best = d
    return 128 * best


def make_ffn_kernel(num_f_chunks, tile_f):
    def ffn_kernel(x_ref, w1_ref, b1_ref, w2_ref, b2_ref, o_ref, acc_ref):
        x = x_ref[...]                                   # (tile_m, D_in_p) bf16

        def chunk_partial(c):
            f0 = c * tile_f
            if not isinstance(f0, int):
                f0 = pl.multiple_of(f0, tile_f)          # aligned dynamic slice
            w1c = w1_ref[:, pl.ds(f0, tile_f)]           # (D_in_p, tile_f) bf16
            b1c = b1_ref[:, pl.ds(f0, tile_f)]           # (1, tile_f)      f32
            # Linear 1 chunk (MXU bf16, f32 accumulate) + bias + ReLU in f32.
            h = jnp.dot(x, w1c, preferred_element_type=jnp.float32) + b1c
            h = jnp.maximum(h, 0.0)
            # Linear 2 partial K-accumulation over this F chunk.
            w2c = w2_ref[pl.ds(f0, tile_f), :]           # (tile_f, D_out_p) bf16
            return jnp.dot(h.astype(w2c.dtype), w2c,
                           preferred_element_type=jnp.float32)

        # Chunk 0 initializes the accumulator and folds in b2 exactly once
        # (avoids a separate broadcast-store pass over the accumulator tile).
        acc_ref[...] = chunk_partial(0) + b2_ref[...]

        if num_f_chunks > 1:
            def f_step(c, carry):
                acc_ref[...] += chunk_partial(c)
                return carry
            lax.fori_loop(1, num_f_chunks, f_step, 0, unroll=True)

        # ReLU after the last layer too (matches the PyTorch forward exactly).
        o_ref[...] = jnp.maximum(acc_ref[...], 0.0).astype(o_ref.dtype)

    return ffn_kernel


def positionwise_feed_forward(x, w1, b1, w2, b2, *, tile_m=256, f_chunk=512,
                              compute_dtype=jnp.bfloat16):
    """x: (B, S, D_in); w1: (D_in, F); b1: (F,); w2: (F, D_out); b2: (D_out,)."""
    B, S, D_in = x.shape
    F = w1.shape[1]
    D_out = w2.shape[1]
    M = B * S

    # Pad feature dims to multiples of 128 (lane-dense loads/stores, MXU-aligned)
    # and pad M to a multiple of the row tile. Zero padding is exact here.
    D_in_p = _round_up(D_in, 128)
    F_p = _round_up(F, 128)
    D_out_p = _round_up(D_out, 128)
    tile_m_eff = min(tile_m, _round_up(M, 8))
    M_p = _round_up(M, tile_m_eff)

    x2 = x.reshape(M, D_in)
    x2p = jnp.pad(x2, ((0, M_p - M), (0, D_in_p - D_in))).astype(compute_dtype)
    w1p = jnp.pad(w1, ((0, D_in_p - D_in), (0, F_p - F))).astype(compute_dtype)
    w2p = jnp.pad(w2, ((0, F_p - F), (0, D_out_p - D_out))).astype(compute_dtype)
    b1p = jnp.pad(b1, (0, F_p - F)).astype(jnp.float32).reshape(1, F_p)
    b2p = jnp.pad(b2, (0, D_out_p - D_out)).astype(jnp.float32).reshape(1, D_out_p)

    tile_f = _pick_tile_f(F_p, max(f_chunk, 128))
    num_f_chunks = F_p // tile_f
    grid = (M_p // tile_m_eff,)

    out_itemsize = jnp.dtype(x.dtype).itemsize
    cd_itemsize = jnp.dtype(compute_dtype).itemsize

    # Advisory cost estimate so XLA can overlap surrounding HLO with the kernel.
    flops = 2 * M_p * (D_in_p * F_p + F_p * D_out_p)
    bytes_accessed = int(
        M_p * D_in_p * cd_itemsize
        + (D_in_p * F_p + F_p * D_out_p) * cd_itemsize
        + (F_p + D_out_p) * 4
        + M_p * D_out_p * out_itemsize
    )
    cost = pl.CostEstimate(flops=int(flops), transcendentals=0,
                           bytes_accessed=bytes_accessed)

    # Explicit VMEM budget: resident weights + biases, double-buffered activation
    # tiles, f32 accumulator and one (tile_m, tile_f) f32 hidden chunk (+2x margin).
    vmem_needed = (
        (D_in_p * F_p + F_p * D_out_p) * cd_itemsize
        + (F_p + D_out_p) * 4
        + 2 * (tile_m_eff * D_in_p * cd_itemsize + tile_m_eff * D_out_p * out_itemsize)
        + tile_m_eff * D_out_p * 4
        + tile_m_eff * tile_f * 4
    )
    vmem_limit = int(min(max(2 * vmem_needed, 32 * 1024 * 1024), 128 * 1024 * 1024))

    out2p = pl.pallas_call(
        make_ffn_kernel(num_f_chunks, tile_f),
        out_shape=jax.ShapeDtypeStruct((M_p, D_out_p), x.dtype),
        grid_spec=pltpu.PrefetchScalarGridSpec(
            num_scalar_prefetch=0,
            grid=grid,
            in_specs=[
                pl.BlockSpec((tile_m_eff, D_in_p), lambda i: (i, 0)),  # x tile
                pl.BlockSpec((D_in_p, F_p), lambda i: (0, 0)),         # W1 (resident)
                pl.BlockSpec((1, F_p), lambda i: (0, 0)),              # b1 (resident)
                pl.BlockSpec((F_p, D_out_p), lambda i: (0, 0)),        # W2 (resident)
                pl.BlockSpec((1, D_out_p), lambda i: (0, 0)),          # b2 (resident)
            ],
            out_specs=pl.BlockSpec((tile_m_eff, D_out_p), lambda i: (i, 0)),
            scratch_shapes=[pltpu.VMEM((tile_m_eff, D_out_p), jnp.float32)],
        ),
        compiler_params=pltpu.CompilerParams(
            dimension_semantics=("parallel",),
            vmem_limit_bytes=vmem_limit,
        ),
        cost_estimate=cost,
    )(x2p, w1p, b1p, w2p, b2p)

    return out2p[:M, :D_out].reshape(B, S, D_out)


def init_params(key, input_depth, filter_size, output_depth, dtype=jnp.float32):
    """Deterministic init mimicking nn.Linear default (uniform +/- 1/sqrt(fan_in))."""
    k1, k2, k3, k4 = jax.random.split(key, 4)
    lim1 = 1.0 / jnp.sqrt(input_depth)
    lim2 = 1.0 / jnp.sqrt(filter_size)
    # Stored as (in, out): equivalent to PyTorch's weight (out, in) transposed.
    w1 = jax.random.uniform(k1, (input_depth, filter_size), dtype, -lim1, lim1)
    b1 = jax.random.uniform(k2, (filter_size,), dtype, -lim1, lim1)
    w2 = jax.random.uniform(k3, (filter_size, output_depth), dtype, -lim2, lim2)
    b2 = jax.random.uniform(k4, (output_depth,), dtype, -lim2, lim2)
    return w1, b1, w2, b2


if __name__ == "__main__":
    # Small shapes consistent with the module: [batch, seq, input_depth]
    batch, seq = 2, 8
    input_depth, filter_size, output_depth = 64, 256, 64

    key = jax.random.PRNGKey(0)
    kx, kp = jax.random.split(key)
    x = jax.random.normal(kx, (batch, seq, input_depth), jnp.float32)
    w1, b1, w2, b2 = init_params(kp, input_depth, filter_size, output_depth)

    # f_chunk=128 -> F is processed in 2 chunks, exercising the in-kernel
    # F-streaming/accumulation path even at these small shapes.
    out = positionwise_feed_forward(x, w1, b1, w2, b2, tile_m=256, f_chunk=128)
    out = jax.block_until_ready(out)
    assert out.shape == (batch, seq, output_depth)

    # Reference with the same numerics as the kernel (bf16 MXU operands,
    # f32 accumulation / bias / ReLU).
    x2 = x.reshape(-1, input_depth)
    h = jnp.dot(x2.astype(jnp.bfloat16), w1.astype(jnp.bfloat16),
                preferred_element_type=jnp.float32) + b1
    h = jnp.maximum(h, 0.0)
    y = jnp.dot(h.astype(jnp.bfloat16), w2.astype(jnp.bfloat16),
                preferred_element_type=jnp.float32) + b2
    ref_bf16 = jnp.maximum(y, 0.0).reshape(batch, seq, output_depth)
    assert jnp.allclose(out, ref_bf16, atol=2e-3, rtol=2e-3)

    # Full-f32 reference: loose tolerance, sanity-checks the module semantics.
    ref_f32 = jnp.maximum(jnp.maximum(x2 @ w1 + b1, 0.0) @ w2 + b2,
                          0.0).reshape(batch, seq, output_depth)
    assert jnp.allclose(out, ref_f32, atol=5e-2, rtol=5e-2)

    print("KERNEL_OK")
</pallas_src>

<mosaic_0001>
module attributes {stable_mosaic.version = 11 : i64} {
  func.func @ffn_kernel(%arg0: i32, %arg1: memref<16x128xbf16, #tpu.memory_space<vmem>>, %arg2: memref<128x256xbf16, #tpu.memory_space<vmem>>, %arg3: memref<1x256xf32, #tpu.memory_space<vmem>>, %arg4: memref<256x128xbf16, #tpu.memory_space<vmem>>, %arg5: memref<1x128xf32, #tpu.memory_space<vmem>>, %arg6: memref<16x128xf32, #tpu.memory_space<vmem>>, %arg7: memref<16x128xf32, #tpu.memory_space<vmem>>) attributes {dimension_semantics = [#tpu.dimension_semantics<parallel>], iteration_bounds = array<i64: 1>, scalar_prefetch = 0 : i64, scratch_operands = 1 : i64, tpu.core_type = #tpu.core_type<tc>, window_params = [{transform_indices = @transform_0, window_bounds = array<i64: 16, 128>}, {pipeline_mode = #tpu.pipeline_mode<synchronous>, transform_indices = @transform_1, window_bounds = array<i64: 128, 256>}, {pipeline_mode = #tpu.pipeline_mode<synchronous>, transform_indices = @transform_2, window_bounds = array<i64: 1, 256>}, {pipeline_mode = #tpu.pipeline_mode<synchronous>, transform_indices = @transform_3, window_bounds = array<i64: 256, 128>}, {pipeline_mode = #tpu.pipeline_mode<synchronous>, transform_indices = @transform_4, window_bounds = array<i64: 1, 128>}, {transform_indices = @transform_5, window_bounds = array<i64: 16, 128>}]} {
    %c0 = arith.constant 0 : index
    %c0_0 = arith.constant 0 : index
    %0 = vector.load %arg1[%c0, %c0_0] : memref<16x128xbf16, #tpu.memory_space<vmem>>, vector<16x128xbf16>
    %c0_1 = arith.constant 0 : index
    %c0_2 = arith.constant 0 : index
    %1 = vector.load %arg2[%c0_1, %c0_2] : memref<128x256xbf16, #tpu.memory_space<vmem>>, vector<128x128xbf16>
    %c0_3 = arith.constant 0 : index
    %c0_4 = arith.constant 0 : index
    %2 = vector.load %arg3[%c0_3, %c0_4] : memref<1x256xf32, #tpu.memory_space<vmem>>, vector<1x128xf32>
    %cst = arith.constant dense<0.000000e+00> : vector<16x128xf32>
    %3 = tpu.matmul %0, %1, %cst {dimension_numbers = #tpu.dot_dimension_numbers<[1], [0], [0], [1], [0, 0, 1, 1], [], []>} : vector<16x128xbf16>, vector<128x128xbf16>, vector<16x128xf32> -> vector<16x128xf32>
    %4 = vector.broadcast %2 : vector<1x128xf32> to vector<16x128xf32>
    %5 = arith.addf %3, %4 : vector<16x128xf32>
    %cst_5 = arith.constant 0.000000e+00 : f32
    %6 = vector.broadcast %cst_5 : f32 to vector<16x128xf32>
    %7 = arith.maximumf %5, %6 : vector<16x128xf32>
    %c0_6 = arith.constant 0 : index
    %c0_7 = arith.constant 0 : index
    %8 = vector.load %arg4[%c0_6, %c0_7] : memref<256x128xbf16, #tpu.memory_space<vmem>>, vector<128x128xbf16>
    %9 = arith.truncf %7 : vector<16x128xf32> to vector<16x128xbf16>
    %cst_8 = arith.constant dense<0.000000e+00> : vector<16x128xf32>
    %10 = tpu.matmul %9, %8, %cst_8 {dimension_numbers = #tpu.dot_dimension_numbers<[1], [0], [0], [1], [0, 0, 1, 1], [], []>} : vector<16x128xbf16>, vector<128x128xbf16>, vector<16x128xf32> -> vector<16x128xf32>
    %c0_9 = arith.constant 0 : index
    %c0_10 = arith.constant 0 : index
    %11 = vector.load %arg5[%c0_9, %c0_10] : memref<1x128xf32, #tpu.memory_space<vmem>>, vector<1x128xf32>
    %12 = vector.broadcast %11 : vector<1x128xf32> to vector<16x128xf32>
    %13 = arith.addf %10, %12 : vector<16x128xf32>
    %c0_11 = arith.constant 0 : index
    %c0_12 = arith.constant 0 : index
    %14 = vector.load %arg7[%c0_11, %c0_12] : memref<16x128xf32, #tpu.memory_space<vmem>>, vector<16x128xf32>
    tpu.vector_store %arg7[%c0_11, %c0_12], %13 {strides = array<i32>} : memref<16x128xf32, #tpu.memory_space<vmem>>, vector<16x128xf32>,
    %c1_i32 = arith.constant 1 : i32
    %c0_13 = arith.constant 0 : index
    %c0_14 = arith.constant 0 : index
    %15 = vector.load %arg7[%c0_13, %c0_14] : memref<16x128xf32, #tpu.memory_space<vmem>>, vector<16x128xf32>
    %c128_i32 = arith.constant 128 : i32
    %16 = arith.muli %c1_i32, %c128_i32 : i32
    %17 = tpu.assume_multiple %16, 128 : i32
    %c0_15 = arith.constant 0 : index
    %18 = arith.index_cast %17 : i32 to index
    %19 = vector.load %arg2[%c0_15, %18] : memref<128x256xbf16, #tpu.memory_space<vmem>>, vector<128x128xbf16>
    %c0_16 = arith.constant 0 : index
    %20 = arith.index_cast %17 : i32 to index
    %21 = vector.load %arg3[%c0_16, %20] : memref<1x256xf32, #tpu.memory_space<vmem>>, vector<1x128xf32>
    %cst_17 = arith.constant dense<0.000000e+00> : vector<16x128xf32>
    %22 = tpu.matmul %0, %19, %cst_17 {dimension_numbers = #tpu.dot_dimension_numbers<[1], [0], [0], [1], [0, 0, 1, 1], [], []>} : vector<16x128xbf16>, vector<128x128xbf16>, vector<16x128xf32> -> vector<16x128xf32>
    %23 = vector.broadcast %21 : vector<1x128xf32> to vector<16x128xf32>
    %24 = arith.addf %22, %23 : vector<16x128xf32>
    %cst_18 = arith.constant 0.000000e+00 : f32
    %25 = vector.broadcast %cst_18 : f32 to vector<16x128xf32>
    %26 = arith.maximumf %24, %25 : vector<16x128xf32>
    %27 = arith.index_cast %17 : i32 to index
    %c0_19 = arith.constant 0 : index
    %28 = vector.load %arg4[%27, %c0_19] : memref<256x128xbf16, #tpu.memory_space<vmem>>, vector<128x128xbf16>
    %29 = arith.truncf %26 : vector<16x128xf32> to vector<16x128xbf16>
    %cst_20 = arith.constant dense<0.000000e+00> : vector<16x128xf32>
    %30 = tpu.matmul %29, %28, %cst_20 {dimension_numbers = #tpu.dot_dimension_numbers<[1], [0], [0], [1], [0, 0, 1, 1], [], []>} : vector<16x128xbf16>, vector<128x128xbf16>, vector<16x128xf32> -> vector<16x128xf32>
    %31 = arith.addf %15, %30 : vector<16x128xf32>
    %c0_21 = arith.constant 0 : index
    %c0_22 = arith.constant 0 : index
    %32 = vector.load %arg7[%c0_21, %c0_22] : memref<16x128xf32, #tpu.memory_space<vmem>>, vector<16x128xf32>
    tpu.vector_store %arg7[%c0_21, %c0_22], %31 {strides = array<i32>} : memref<16x128xf32, #tpu.memory_space<vmem>>, vector<16x128xf32>,
    %c1_i32_23 = arith.constant 1 : i32
    %c0_24 = arith.constant 0 : index
    %c0_25 = arith.constant 0 : index
    %33 = vector.load %arg7[%c0_24, %c0_25] : memref<16x128xf32, #tpu.memory_space<vmem>>, vector<16x128xf32>
    %cst_26 = arith.constant 0.000000e+00 : f32
    %34 = vector.broadcast %cst_26 : f32 to vector<16x128xf32>
    %35 = arith.maximumf %33, %34 : vector<16x128xf32>
    %c0_27 = arith.constant 0 : index
    %c0_28 = arith.constant 0 : index
    %36 = vector.load %arg6[%c0_27, %c0_28] : memref<16x128xf32, #tpu.memory_space<vmem>>, vector<16x128xf32>
    tpu.vector_store %arg6[%c0_27, %c0_28], %35 {strides = array<i32>} : memref<16x128xf32, #tpu.memory_space<vmem>>, vector<16x128xf32>,
    return
  }
  func.func @transform_0(%arg0: i32) -> (i32, i32) {
    %c0_i32 = arith.constant 0 : i32
    %c0_i32_0 = arith.constant 0 : i32
    return %arg0, %c0_i32 : i32, i32
  }
  func.func @transform_1(%arg0: i32) -> (i32, i32) {
    %c0_i32 = arith.constant 0 : i32
    %c0_i32_0 = arith.constant 0 : i32
    %c0_i32_1 = arith.constant 0 : i32
    return %c0_i32, %c0_i32_0 : i32, i32
  }
  func.func @transform_2(%arg0: i32) -> (i32, i32) {
    %c0_i32 = arith.constant 0 : i32
    %c0_i32_0 = arith.constant 0 : i32
    %c0_i32_1 = arith.constant 0 : i32
    return %c0_i32, %c0_i32_0 : i32, i32
  }
  func.func @transform_3(%arg0: i32) -> (i32, i32) {
    %c0_i32 = arith.constant 0 : i32
    %c0_i32_0 = arith.constant 0 : i32
    %c0_i32_1 = arith.constant 0 : i32
    return %c0_i32, %c0_i32_0 : i32, i32
  }
  func.func @transform_4(%arg0: i32) -> (i32, i32) {
    %c0_i32 = arith.constant 0 : i32
    %c0_i32_0 = arith.constant 0 : i32
    %c0_i32_1 = arith.constant 0 : i32
    return %c0_i32, %c0_i32_0 : i32, i32
  }
  func.func @transform_5(%arg0: i32) -> (i32, i32) {
    %c0_i32 = arith.constant 0 : i32
    %c0_i32_0 = arith.constant 0 : i32
    return %arg0, %c0_i32 : i32, i32
  }
}

</mosaic_0001>

<bundles_post_ra>
// kernel: tpu_custom_call.1
= control target key start
LH: loop header
LB: loop body
LE: loop exit
PB: predicated region body
PF: predicated region fallthrough
CT: control target
= control target key end

     0   :  { %10 = vsyncpa [#allocation4], 0  ;;  %s826_s0 = inlined_call_operand.hbm [shape: bf16[16,128], index: 0, kind: input, shape index: {}]   ;;  %s827_s1 = inlined_call_operand.hbm [shape: bf16[128,256], index: 1, kind: input, shape index: {}]   ;;  %s828_s2 = inlined_call_operand.hbm [shape: f32[1,256], index: 2, kind: input, shape index: {}]   ;;  %s829_s3 = inlined_call_operand.hbm [shape: bf16[256,128], index: 3, kind: input, shape index: {}]   ;;  %s830_s4 = inlined_call_operand.vmem [shape: f32[1,128], index: 4, kind: input, shape index: {}]   ;;  %s831_s5 = inlined_call_operand.hbm [shape: f32[16,128], index: 5, kind: output, shape index: {}]  }
   0x1   :  { %11 = vsyncpa [#allocation7], 0 }
   0x2   :  { %12 = vsyncpa [#allocation10], 0  ;;  %s31_s20 = sshll.u32 %s827_s1, 4  ;;  %s32_s20 = int_to_ptr.hbm [resolvable:$true] %s31_s20 }
   0x3   :  { %13 = vsyncpa [#allocation5], 0  ;;  %s763_s21 = smov [#allocation6]   ;;  %s18_s25 = sshll.u32 %s826_s0, 4  ;;  %s19_s25 = int_to_ptr.hbm [resolvable:$true] %s18_s25 }
   0x4   :  { %s33_s22 = sshll.u32 %s763_s21, 4  ;;  %s764_s26 = smov 128   ;;  %s34_s22 = int_to_ptr.vmem [resolvable:$true] %s33_s22 }
   0x5   :  { %s765_s27 = smov 8   ;;  %s766_s28 = smov [#allocation3]  }
   0x6   :  { %39 = dma.hbm_to_vmem [thread:$0]  %s32_s20, 2048, %s34_s22, [#allocation7], %s764_s26, %s764_s26, %s765_s27  }
   0x7   :  { %s20_s29 = sshll.u32 %s766_s28, 4  ;;  %s767_s1 = smov 64   ;;  %s21_s29 = int_to_ptr.vmem [resolvable:$true] %s20_s29 }
   0x8   :  { %s768_s30 = smov 4   ;;  %s45_s8 = sshll.u32 %s828_s2, 4  ;;  %s46_s8 = int_to_ptr.hbm [resolvable:$true] %s45_s8 }
   0x9   :  { %26 = dma.hbm_to_vmem [thread:$0]  %s19_s25, 128, %s21_s29, [#allocation4], %s767_s1, %s767_s1, %s768_s30  }
   0xa   :  { %s769_s9 = smov [#allocation8]   ;;  %s55_s12 = sshll.u32 %s829_s3, 4  ;;  %s56_s12 = int_to_ptr.hbm [resolvable:$true] %s55_s12 }
   0xb   :  { %s47_s0 = sshll.u32 %s769_s9, 4  ;;  %s770_s13 = smov [#allocation9]   ;;  %s48_s0 = int_to_ptr.vmem [resolvable:$true] %s47_s0 }
   0xc   :  { %50 = dma.hbm_to_vmem [thread:$0]  %s46_s8, 32, %s48_s0, [#allocation7]  }
   0xd   :  { %s57_s14 = sshll.u32 %s770_s13, 4  ;;  %s58_s14 = int_to_ptr.vmem [resolvable:$true] %s57_s14 }
   0xe   :  { %63 = dma.hbm_to_vmem [thread:$0]  %s56_s12, 2048, %s58_s14, [#allocation10], %s767_s1, %s767_s1, %s768_s30  }
   0xf   :  { %755 = dma.done.wait [#allocation4], 128  }
  0x10   :  { %756 = vsyncadd [#allocation4], 4294967168 }
  0x11   :  { %757 = dma.done.wait [#allocation7], 2080  }
  0x12   :  { %758 = vsyncadd [#allocation7], 4294965216 }
  0x13   :  { %759 = dma.done.wait [#allocation10], 2048  }
  0x14   :  { %760 = vsyncadd [#allocation10], 4294965248  ;;  %v492_v0 = vld [vmem:[#allocation6 + $0x70] sm:$0xf]  ;;  %v598_v1 = vld [vmem:[#allocation6 + $0x74] sm:$0xf0] }
  0x15   :  { %v556_v2 = vld [vmem:[#allocation6 + $0x74] sm:$0xf]  ;;  %v493_v3 = vor.u32 %v598_v1, %v492_v0  ;;  %v614_v4 = vld [vmem:[#allocation6 + $0x78] sm:$0xf0]  ;;  %v488_v5 = vld [vmem:[#allocation6 + $0x60] sm:$0xf] }
  0x16   :  { %v597_v6 = vld [vmem:[#allocation6 + $0x64] sm:$0xf0]  ;;  %v557_v7 = vor.u32 %v614_v4, %v556_v2  ;;  %v552_v8 = vld [vmem:[#allocation6 + $0x64] sm:$0xf]  ;;  %v613_v9 = vld [vmem:[#allocation6 + $0x68] sm:$0xf0] }
  0x17   :  { %158 = vmatpush.bf16.msra.mxu0 %v493_v3  ;;  %v489_v10 = vor.u32 %v597_v6, %v488_v5  ;;  %v553_v11 = vor.u32 %v613_v9, %v552_v8  ;;  %v484_v12 = vld [vmem:[#allocation6 + $0x50] sm:$0xf]  ;;  %v596_v13 = vld [vmem:[#allocation6 + $0x54] sm:$0xf0]  ;;  %v548_v14 = vld [vmem:[#allocation6 + $0x54] sm:$0xf] }
  0x18   :  { %331 = vmatpush.bf16.msra.mxu2 %v557_v7  ;;  %v612_v15 = vld [vmem:[#allocation6 + $0x58] sm:$0xf0]  ;;  %v485_v16 = vor.u32 %v596_v13, %v484_v12  ;;  %v480_v18 = vld [vmem:[#allocation6 + $0x40] sm:$0xf]  ;;  %v595_v19 = vld [vmem:[#allocation6 + $0x44] sm:$0xf0] }
  0x19   :  { %v549_v17 = vor.u32 %v612_v15, %v548_v14  ;;  %v544_v20 = vld [vmem:[#allocation6 + $0x44] sm:$0xf]  ;;  %v611_v21 = vld [vmem:[#allocation6 + $0x48] sm:$0xf0]  ;;  %v481_v22 = vor.u32 %v595_v19, %v480_v18  ;;  %v476_v23 = vld [vmem:[#allocation6 + $0x30] sm:$0xf] }
  0x1a   :  { %v606_v24 = vld [vmem:[#allocation9 + $0x38] sm:$0xff]  ;;  %v545_v26 = vor.u32 %v611_v21, %v544_v20  ;;  %v540_v28 = vld [vmem:[#allocation6 + $0x34] sm:$0xf]  ;;  %v593_v35 = vld [vmem:[#allocation6 + $0x24] sm:$0xf0]  ;;  %s771_s15 = smov [#allocation11]  }
  0x1b   :  { %159 = vmatpush.bf16.msra.mxu0 %v489_v10  ;;  %v622_v25 = vld [vmem:[#allocation9 + $0x78] sm:$0xff]  ;;  %243 = vmatpush.bf16.msra.mxu1 %v606_v24  ;;  %v605_v30 = vld [vmem:[#allocation9 + $0x30] sm:$0xff]  ;;  %v536_v36 = vld [vmem:[#allocation6 + $0x24] sm:$0xf]  ;;  %s441_s16 = sshll.u32 %s771_s15, 4  ;;  %s443_s19 = sshll.u32 %s831_s5, 4  ;;  %s442_s16 = int_to_ptr.vmem [resolvable:$true] %s441_s16  ;;  %s444_s19 = int_to_ptr.hbm [resolvable:$true] %s443_s19 }
  0x1c   :  { %332 = vmatpush.bf16.msra.mxu2 %v553_v11  ;;  %v594_v27 = vld [vmem:[#allocation6 + $0x34] sm:$0xf0]  ;;  %v610_v29 = vld [vmem:[#allocation6 + $0x38] sm:$0xf0]  ;;  %413 = vmatpush.bf16.msra.mxu3 %v622_v25  ;;  %v472_v34 = vld [vmem:[#allocation6 + $0x20] sm:$0xf] }
  0x1d   :  { %v621_v31 = vld [vmem:[#allocation9 + $0x70] sm:$0xff]  ;;  %v477_v32 = vor.u32 %v594_v27, %v476_v23  ;;  %v541_v33 = vor.u32 %v610_v29, %v540_v28  ;;  %v609_v37 = vld [vmem:[#allocation6 + $0x28] sm:$0xf0]  ;;  %v473_v40 = vor.u32 %v593_v35, %v472_v34  ;;  %v608_v45 = vld [vmem:[#allocation6 + $0x18] sm:$0xf0] }
  0x1e   :  { %v604_v38 = vld [vmem:[#allocation9 + $0x28] sm:$0xff]  ;;  %v537_v41 = vor.u32 %v609_v37, %v536_v36  ;;  %v592_v43 = vld [vmem:[#allocation6 + $0x14] sm:$0xf0]  ;;  %v532_v44 = vld [vmem:[#allocation6 + $0x14] sm:$0xf] }
  0x1f   :  { %160 = vmatpush.bf16.msra.mxu0 %v485_v16  ;;  %244 = vmatpush.bf16.msra.mxu1 %v605_v30  ;;  %v620_v39 = vld [vmem:[#allocation9 + $0x68] sm:$0xff]  ;;  %v603_v46 = vld [vmem:[#allocation9 + $0x20] sm:$0xff]  ;;  %v533_v48 = vor.u32 %v608_v45, %v532_v44  ;;  %v590_v55 = vld [vmem:[#allocation3] sm:$0xff] }
  0x20   :  { %333 = vmatpush.bf16.msra.mxu2 %v549_v17  ;;  %414 = vmatpush.bf16.msra.mxu3 %v621_v31  ;;  %v468_v42 = vld [vmem:[#allocation6 + $0x10] sm:$0xf]  ;;  %v464_v49 = vld [vmem:[#allocation6] sm:$0xf]  ;;  %v591_v50 = vld [vmem:[#allocation6 + $0x4] sm:$0xf0] }
  0x21   :  { %v469_v47 = vor.u32 %v592_v43, %v468_v42  ;;  %v528_v51 = vld [vmem:[#allocation6 + $0x4] sm:$0xf]  ;;  %v607_v52 = vld [vmem:[#allocation6 + $0x8] sm:$0xf0]  ;;  %v465_v53 = vor.u32 %v591_v50, %v464_v49  ;;  %v602_v56 = vld [vmem:[#allocation9 + $0x18] sm:$0xff] }
  0x22   :  { %v529_v54 = vor.u32 %v607_v52, %v528_v51  ;;  %v619_v57 = vld [vmem:[#allocation9 + $0x60] sm:$0xff]  ;;  %v601_v58 = vld [vmem:[#allocation9 + $0x10] sm:$0xff]  ;;  %v618_v59 = vld [vmem:[#allocation9 + $0x58] sm:$0xff] }
  0x23   :  { %161 = vmatpush.bf16.msra.mxu0 %v481_v22  ;;  %245 = vmatpush.bf16.msra.mxu1 %v604_v38  ;;  %v600_v60 = vld [vmem:[#allocation9 + $0x8] sm:$0xff]  ;;  %v617_v61 = vld [vmem:[#allocation9 + $0x50] sm:$0xff]  ;;  %v599_v62 = vld [vmem:[#allocation9] sm:$0xff] }
  0x24   :  { %334 = vmatpush.bf16.msra.mxu2 %v545_v26  ;;  %415 = vmatpush.bf16.msra.mxu3 %v620_v39  ;;  %v616_v63 = vld [vmem:[#allocation9 + $0x48] sm:$0xff]  ;;  %v615_v0 = vld [vmem:[#allocation9 + $0x40] sm:$0xff]  ;;  %v632_v2 = vld [vmem:[#allocation8] ss:$0 sm:$0xff] }
  0x25   :  { %v633_v8 = vld [vmem:[#allocation8 + $0x1] ss:$0 sm:$0xff]  ;;  %v634_v18 = vld [vmem:[%s830_s4] ss:$0 sm:$0xff] }
  0x27   :  { %162 = vmatpush.bf16.msra.mxu0 %v477_v32  ;;  %246 = vmatpush.bf16.msra.mxu1 %v603_v46 }
  0x28   :  { %335 = vmatpush.bf16.msra.mxu2 %v541_v33  ;;  %416 = vmatpush.bf16.msra.mxu3 %v619_v57 }
  0x2b   :  { %163 = vmatpush.bf16.msra.mxu0 %v473_v40  ;;  %247 = vmatpush.bf16.msra.mxu1 %v602_v56 }
  0x2c   :  { %336 = vmatpush.bf16.msra.mxu2 %v537_v41  ;;  %417 = vmatpush.bf16.msra.mxu3 %v618_v59 }
  0x2f   :  { %164 = vmatpush.bf16.msra.mxu0 %v469_v47  ;;  %248 = vmatpush.bf16.msra.mxu1 %v601_v58 }
  0x30   :  { %337 = vmatpush.bf16.msra.mxu2 %v533_v48  ;;  %418 = vmatpush.bf16.msra.mxu3 %v617_v61 }
  0x33   :  { %165 = vmatpush.bf16.msra.mxu0 %v465_v53  ;;  %249 = vmatpush.bf16.msra.mxu1 %v600_v60 }
  0x34   :  { %338 = vmatpush.bf16.msra.mxu2 %v529_v54  ;;  %419 = vmatpush.bf16.msra.mxu3 %v616_v63 }
  0x36   :  { %166 = vmatmul.bf16.vlgmr.msra.gmra.mxu0 %v590_v55 }
  0x37   :  { %339 = vmatmul.bf16.vlgmr.msra.gmra.mxu2 %v590_v55  ;;  %250 = vmatpush.bf16.msra.mxu1 %v599_v62 }
  0x38   :  { %420 = vmatpush.bf16.msra.mxu3 %v615_v0 }
  0xb3   :  { %v167_v1 = vpop.f32.mrf.mxu0 }
  0xb4   :  { %v168_v3 = vadd.f32 %v632_v2, %v167_v1 }
  0xb6   :  { %v172_v6 = vmax.f32 %v168_v3, 0.0 }
  0xba   :  { %v340_v4 = vpop.f32.mrf.mxu2 }
  0xbb   :  { %v169_v5 = vpop.f32.mrf.mxu0  ;;  %v341_v11 = vadd.f32 %v633_v8, %v340_v4 }
  0xbc   :  { %v170_v7 = vadd.f32 %v632_v2, %v169_v5 }
  0xbd   :  { %v345_v14 = vmax.f32 %v341_v11, 0.0 }
  0xbe   :  { %v173_v9 = vmax.f32 %v170_v7, 0.0 }
  0xc0   :  { %v190_v10 = vpack.c.bf16 %v173_v9, %v172_v6 }
  0xc2   :  { %v342_v12 = vpop.f32.mrf.mxu2  ;;  %251 = vmatmul.bf16.vlgmr.msra.gmra.mxu1 %v190_v10 }
  0xc3   :  { %v343_v13 = vadd.f32 %v633_v8, %v342_v12 }
  0xc5   :  { %v346_v15 = vmax.f32 %v343_v13, 0.0 }
  0xc7   :  { %v364_v16 = vpack.c.bf16 %v346_v15, %v345_v14 }
  0xc9   :  { %421 = vmatmul.bf16.vlgmr.msra.gmra.mxu3 %v364_v16 }
 0x13f   :  { %v252_v17 = vpop.f32.mrf.mxu1 }
 0x140   :  { %v253_v19 = vadd.f32 %v634_v18, %v252_v17 }
 0x147   :  { %v254_v23 = vpop.f32.mrf.mxu1 }
 0x148   :  { %v255_v24 = vadd.f32 %v634_v18, %v254_v23 }
 0x14c   :  { %v422_v20 = vpop.f32.mrf.mxu3 }
 0x14d   :  { %v427_v21 = vadd.f32 %v422_v20, %v253_v19 }
 0x14f   :  { %v433_v22 = vmax.f32 %v427_v21, 0.0 }
 0x151   :  { %435 = vst [vmem:[#allocation11] sm:$0xff] %v433_v22 }
 0x154   :  { %v424_v25 = vpop.f32.mrf.mxu3 }
 0x155   :  { %v428_v26 = vadd.f32 %v424_v25, %v255_v24 }
 0x157   :  { %v434_v27 = vmax.f32 %v428_v26, 0.0 }
 0x159   :  { %436 = vst [vmem:[#allocation11 + $0x8] sm:$0xff] %v434_v27 }
 0x15a   :  { %449 = dma.vmem_to_hbm [thread:$0]  %s442_s16, 256, %s444_s19, [#allocation5], %s764_s26, %s764_s26, %s765_s27  }
 0x15b   :  { %761 = dma.done.wait [#allocation5], 256  }
 0x15c   :  { %762 = vsyncadd [#allocation5], 4294967040 }
 0x15d   :  { %454 = vsyncpa [#allocation4], 1 }
 0x15e   :  { %455 = vsyncpa [#allocation7], 1 }
 0x15f   :  { %456 = vsyncpa [#allocation10], 1 }
 0x160   :  { %457 = vsyncpa [#allocation5], 1 }

</bundles_post_ra>
